<compile_context>
chip_gen: v7x
topology: tpu7x:2x2x1
jax: 0.10.0
libtpu: 0.0.40
codegen_flags: <defaults>
</compile_context>

<pallas_src>
import functools

import jax
import jax.numpy as jnp
from jax.experimental import pallas as pl
from jax.experimental.pallas import tpu as pltpu

LN_EPS = 1e-5
LANE = 128


def _round_up(x, m):
    return (x + m - 1) // m * m


# ---------------------------------------------------------------------------
# Kernel
# ---------------------------------------------------------------------------
def _ffn_kernel(x_ref, w1_ref, b1_ref, w2_ref, b2_ref, gamma_ref, beta_ref,
                o_ref, *, d_true):
    # x_ref: (TM, Dp); w1_ref: (Dp, Fp); b1_ref: (1, Fp) f32;
    # w2_ref: (Fp, Dp); b2/gamma/beta: (1, Dp) f32.
    x = x_ref[...]

    # first 1x1 conv: x @ W1^T on the MXU (compute/weight dtype), f32 acc.
    h = jnp.dot(x.astype(w1_ref.dtype), w1_ref[...],
                preferred_element_type=jnp.float32)
    # bias add in f32, then immediately drop to the compute dtype so ReLU and
    # the second matmul operand stay packed (halves VALU work when bf16).
    h = jnp.maximum((h + b1_ref[...]).astype(w2_ref.dtype),
                    jnp.zeros((), w2_ref.dtype))

    # second 1x1 conv back to model_dim, f32 accumulation.
    y = jnp.dot(h, w2_ref[...], preferred_element_type=jnp.float32)
    y = y + b2_ref[...]

    # dropout p=0.0 is identity; non-zero dropout would need pltpu.prng_* here.

    # residual + LayerNorm over the TRUE feature width (padded columns of z
    # are exact zeros, so the sums below only see the real features).
    z = x.astype(jnp.float32) + y
    inv_d = 1.0 / d_true
    mean = jnp.sum(z, axis=-1, keepdims=True) * inv_d
    mean_sq = jnp.sum(z * z, axis=-1, keepdims=True) * inv_d
    var = mean_sq - mean * mean
    znorm = (z - mean) * jax.lax.rsqrt(var + LN_EPS)
    o_ref[...] = (znorm * gamma_ref[...] + beta_ref[...]).astype(o_ref.dtype)


# ---------------------------------------------------------------------------
# Parameter preparation (hoisted out of the per-call path)
# ---------------------------------------------------------------------------
def prepare_ffn_params(w1, b1, w2, b2, gamma, beta, *, compute_dtype=None):
    """Transpose, lane-pad and (optionally) cast the FFN parameters ONCE.

    w1: (ffn_dim, model_dim)   Conv1d(model_dim, ffn_dim, 1) weight, kernel dim squeezed
    b1: (ffn_dim,)
    w2: (model_dim, ffn_dim)
    b2, gamma, beta: (model_dim,)
    compute_dtype: dtype fed to the MXU (e.g. jnp.bfloat16 on v6e/v7x for the
      3-4x matmul throughput path); defaults to the weight dtype.  Accumulation,
      bias/residual/LayerNorm math stay f32 regardless.
    """
    F, D = w1.shape
    Dp = _round_up(D, LANE)
    Fp = _round_up(F, LANE)
    wdt = jnp.dtype(compute_dtype) if compute_dtype is not None else w1.dtype

    w1t = jnp.pad(jnp.transpose(w1).astype(wdt), ((0, Dp - D), (0, Fp - F)))
    w2t = jnp.pad(jnp.transpose(w2).astype(wdt), ((0, Fp - F), (0, Dp - D)))
    b1r = jnp.pad(b1.astype(jnp.float32), (0, Fp - F)).reshape(1, Fp)
    b2r = jnp.pad(b2.astype(jnp.float32), (0, Dp - D)).reshape(1, Dp)
    gr = jnp.pad(gamma.astype(jnp.float32), (0, Dp - D)).reshape(1, Dp)
    br = jnp.pad(beta.astype(jnp.float32), (0, Dp - D)).reshape(1, Dp)
    return dict(w1t=w1t, b1=b1r, w2t=w2t, b2=b2r, gamma=gr, beta=br,
                model_dim=D, ffn_dim=F)


# ---------------------------------------------------------------------------
# Tiling / compiler-parameter helpers
# ---------------------------------------------------------------------------
def _vmem_limit_bytes():
    # Generation-aware scoped-VMEM limit: v7x TensorCores only have 64 MiB of
    # physical VMEM (leave headroom for compiler scratch / semaphores), while
    # v5e/v6e have 128 MiB and benefit from a higher cap (bigger row tiles).
    cap = None
    if hasattr(pltpu, "get_tpu_info"):
        try:
            cap = pltpu.get_tpu_info().vmem_capacity_bytes
        except Exception:
            cap = None  # hardware query unavailable -> known-good default below
    if cap is None:
        return 64 * 1024 * 1024                       # unknown part: conservative
    if cap >= 128 * 1024 * 1024:
        return 100 * 1024 * 1024                      # v5e / v6e (128 MiB parts)
    return max(32 * 1024 * 1024,                      # v7x class (64 MiB)
               min(cap - 12 * 1024 * 1024, 52 * 1024 * 1024))


def _choose_row_tile(rows, requested):
    rows8 = _round_up(rows, 8)
    tile = max(8, min(_round_up(requested, 8), rows8))
    # Keep the grid >= ~8 steps so the single "parallel" row axis load-balances
    # across v7x's two TensorCores; never shrink below 256 rows (MXU occupancy).
    while tile >= 512 and pl.cdiv(rows8, tile) < 8:
        tile //= 2
    return max(8, _round_up(tile, 8))


def _build_call(padded_rows, row_tile, Dp, Fp, d_true, out_dtype, w_dtype):
    grid = (padded_rows // row_tile,)

    itemsize_x = jnp.dtype(out_dtype).itemsize
    itemsize_w = jnp.dtype(w_dtype).itemsize
    cost = pl.CostEstimate(
        flops=4 * padded_rows * Dp * Fp,
        transcendentals=padded_rows,
        bytes_accessed=2 * padded_rows * Dp * itemsize_x + 2 * Dp * Fp * itemsize_w,
    )

    kernel = functools.partial(_ffn_kernel, d_true=float(d_true))

    def const_spec(shape):
        # Constant-resident blocks: index_map never changes, so they are DMA'd
        # once and revisited.  Default buffering is used on purpose - the
        # previous pl.Buffered(1) + silent `except Exception` fallback could
        # mask real lowering/VMEM errors (review item).
        return pl.BlockSpec(shape, lambda i: (0, 0))

    return pl.pallas_call(
        kernel,
        out_shape=jax.ShapeDtypeStruct((padded_rows, Dp), out_dtype),
        grid_spec=pltpu.PrefetchScalarGridSpec(
            num_scalar_prefetch=0,
            grid=grid,
            in_specs=[
                pl.BlockSpec((row_tile, Dp), lambda i: (i, 0)),  # x rows (pipelined)
                const_spec((Dp, Fp)),   # W1^T (resident)
                const_spec((1, Fp)),    # b1
                const_spec((Fp, Dp)),   # W2^T (resident)
                const_spec((1, Dp)),    # b2
                const_spec((1, Dp)),    # gamma
                const_spec((1, Dp)),    # beta
            ],
            out_specs=pl.BlockSpec((row_tile, Dp), lambda i: (i, 0)),
        ),
        compiler_params=pltpu.CompilerParams(
            dimension_semantics=("parallel",),
            vmem_limit_bytes=_vmem_limit_bytes(),
        ),
        cost_estimate=cost,
    )


# ---------------------------------------------------------------------------
# Forward wrapper
# ---------------------------------------------------------------------------
def feed_forward(x, params, *, row_tile=512):
    """x: (B, S, model_dim); params: output of prepare_ffn_params.
    Returns (B, S, model_dim)."""
    B, S, D = x.shape
    assert D == params["model_dim"], "x feature dim must match prepared params"
    Dp, Fp = params["w1t"].shape
    rows = B * S

    tile = _choose_row_tile(rows, row_tile)
    padded_rows = _round_up(rows, tile)

    x2d = x.reshape(rows, D)
    if padded_rows != rows or Dp != D:
        x2d = jnp.pad(x2d, ((0, padded_rows - rows), (0, Dp - D)))

    call = _build_call(padded_rows, tile, Dp, Fp, D, x.dtype, params["w1t"].dtype)
    out2d = call(x2d, params["w1t"], params["b1"], params["w2t"], params["b2"],
                 params["gamma"], params["beta"])

    return out2d[:rows, :D].reshape(B, S, D)


# ---------------------------------------------------------------------------
# Pure-JAX reference
# ---------------------------------------------------------------------------
def _reference(x, w1, b1, w2, b2, gamma, beta):
    h = jnp.maximum(jnp.einsum("bsd,fd->bsf", x, w1) + b1, 0.0)
    y = jnp.einsum("bsf,df->bsd", h, w2) + b2
    z = x + y
    mean = jnp.mean(z, axis=-1, keepdims=True)
    var = jnp.mean((z - mean) ** 2, axis=-1, keepdims=True)
    return (z - mean) / jnp.sqrt(var + LN_EPS) * gamma + beta


if __name__ == "__main__":
    # Small shapes consistent with the module: model_dim=32, ffn_dim=64, batch=2, seq=8.
    B, S, D, FFN = 2, 8, 32, 64

    key = jax.random.PRNGKey(0)
    kx, k1, kb1, k2, kb2 = jax.random.split(key, 5)

    x = jax.random.normal(kx, (B, S, D), dtype=jnp.float32)

    # Conv1d(model_dim, ffn_dim, 1) weight is (ffn_dim, model_dim, 1); stored squeezed.
    w1 = jax.random.normal(k1, (FFN, D), dtype=jnp.float32) * (1.0 / jnp.sqrt(D))
    b1 = jax.random.normal(kb1, (FFN,), dtype=jnp.float32) * 0.01
    w2 = jax.random.normal(k2, (D, FFN), dtype=jnp.float32) * (1.0 / jnp.sqrt(FFN))
    b2 = jax.random.normal(kb2, (D,), dtype=jnp.float32) * 0.01

    # LayerNorm params: default init (ones / zeros).
    gamma = jnp.ones((D,), dtype=jnp.float32)
    beta = jnp.zeros((D,), dtype=jnp.float32)

    # Parameters are prepared ONCE (transpose / lane-pad / cast hoisted out of
    # the per-call path).  Pass compute_dtype=jnp.bfloat16 for the bf16 MXU
    # path on v6e/v7x; the f32 path is kept here for the exact reference check.
    params = prepare_ffn_params(w1, b1, w2, b2, gamma, beta)

    out = feed_forward(x, params)
    jax.block_until_ready(out)

    ref = _reference(x, w1, b1, w2, b2, gamma, beta)
    assert out.shape == (B, S, D)
    assert jnp.allclose(out, ref, atol=1e-4, rtol=1e-4), "mismatch vs reference"

    print("KERNEL_OK")
</pallas_src>

<mosaic_0001>
module attributes {stable_mosaic.version = 11 : i64} {
  func.func @_ffn_kernel(%arg0: i32, %arg1: memref<16x128xf32, #tpu.memory_space<vmem>>, %arg2: memref<128x128xf32, #tpu.memory_space<vmem>>, %arg3: memref<1x128xf32, #tpu.memory_space<vmem>>, %arg4: memref<128x128xf32, #tpu.memory_space<vmem>>, %arg5: memref<1x128xf32, #tpu.memory_space<vmem>>, %arg6: memref<1x128xf32, #tpu.memory_space<vmem>>, %arg7: memref<1x128xf32, #tpu.memory_space<vmem>>, %arg8: memref<16x128xf32, #tpu.memory_space<vmem>>) attributes {dimension_semantics = [#tpu.dimension_semantics<parallel>], iteration_bounds = array<i64: 1>, scalar_prefetch = 0 : i64, scratch_operands = 0 : i64, tpu.core_type = #tpu.core_type<tc>, window_params = [{transform_indices = @transform_0, window_bounds = array<i64: 16, 128>}, {pipeline_mode = #tpu.pipeline_mode<synchronous>, transform_indices = @transform_1, window_bounds = array<i64: 128, 128>}, {pipeline_mode = #tpu.pipeline_mode<synchronous>, transform_indices = @transform_2, window_bounds = array<i64: 1, 128>}, {pipeline_mode = #tpu.pipeline_mode<synchronous>, transform_indices = @transform_3, window_bounds = array<i64: 128, 128>}, {pipeline_mode = #tpu.pipeline_mode<synchronous>, transform_indices = @transform_4, window_bounds = array<i64: 1, 128>}, {pipeline_mode = #tpu.pipeline_mode<synchronous>, transform_indices = @transform_5, window_bounds = array<i64: 1, 128>}, {pipeline_mode = #tpu.pipeline_mode<synchronous>, transform_indices = @transform_6, window_bounds = array<i64: 1, 128>}, {transform_indices = @transform_7, window_bounds = array<i64: 16, 128>}]} {
    %c0 = arith.constant 0 : index
    %c0_0 = arith.constant 0 : index
    %0 = vector.load %arg1[%c0, %c0_0] : memref<16x128xf32, #tpu.memory_space<vmem>>, vector<16x128xf32>
    %c0_1 = arith.constant 0 : index
    %c0_2 = arith.constant 0 : index
    %1 = vector.load %arg2[%c0_1, %c0_2] : memref<128x128xf32, #tpu.memory_space<vmem>>, vector<128x128xf32>
    %cst = arith.constant dense<0.000000e+00> : vector<16x128xf32>
    %2 = tpu.matmul %0, %1, %cst {dimension_numbers = #tpu.dot_dimension_numbers<[1], [0], [0], [1], [0, 0, 1, 1], [], []>} : vector<16x128xf32>, vector<128x128xf32>, vector<16x128xf32> -> vector<16x128xf32>
    %c0_3 = arith.constant 0 : index
    %c0_4 = arith.constant 0 : index
    %3 = vector.load %arg3[%c0_3, %c0_4] : memref<1x128xf32, #tpu.memory_space<vmem>>, vector<1x128xf32>
    %4 = vector.broadcast %3 : vector<1x128xf32> to vector<16x128xf32>
    %5 = arith.addf %2, %4 : vector<16x128xf32>
    %cst_5 = arith.constant 0.000000e+00 : f32
    %6 = vector.broadcast %cst_5 : f32 to vector<16x128xf32>
    %7 = arith.maximumf %5, %6 : vector<16x128xf32>
    %c0_6 = arith.constant 0 : index
    %c0_7 = arith.constant 0 : index
    %8 = vector.load %arg4[%c0_6, %c0_7] : memref<128x128xf32, #tpu.memory_space<vmem>>, vector<128x128xf32>
    %cst_8 = arith.constant dense<0.000000e+00> : vector<16x128xf32>
    %9 = tpu.matmul %7, %8, %cst_8 {dimension_numbers = #tpu.dot_dimension_numbers<[1], [0], [0], [1], [0, 0, 1, 1], [], []>} : vector<16x128xf32>, vector<128x128xf32>, vector<16x128xf32> -> vector<16x128xf32>
    %c0_9 = arith.constant 0 : index
    %c0_10 = arith.constant 0 : index
    %10 = vector.load %arg5[%c0_9, %c0_10] : memref<1x128xf32, #tpu.memory_space<vmem>>, vector<1x128xf32>
    %11 = vector.broadcast %10 : vector<1x128xf32> to vector<16x128xf32>
    %12 = arith.addf %9, %11 : vector<16x128xf32>
    %13 = arith.addf %0, %12 : vector<16x128xf32>
    %cst_11 = arith.constant dense<0.000000e+00> : vector<16xf32>
    %14 = vector.multi_reduction <add>, %13, %cst_11 [1] : vector<16x128xf32> to vector<16xf32>
    %15 = vector.shape_cast %14 : vector<16xf32> to vector<16x1xf32>
    %cst_12 = arith.constant 3.125000e-02 : f32
    %16 = vector.broadcast %cst_12 : f32 to vector<16x1xf32>
    %17 = arith.mulf %15, %16 : vector<16x1xf32>
    %18 = arith.mulf %13, %13 : vector<16x128xf32>
    %cst_13 = arith.constant dense<0.000000e+00> : vector<16xf32>
    %19 = vector.multi_reduction <add>, %18, %cst_13 [1] : vector<16x128xf32> to vector<16xf32>
    %20 = vector.shape_cast %19 : vector<16xf32> to vector<16x1xf32>
    %cst_14 = arith.constant 3.125000e-02 : f32
    %21 = vector.broadcast %cst_14 : f32 to vector<16x1xf32>
    %22 = arith.mulf %20, %21 : vector<16x1xf32>
    %23 = arith.mulf %17, %17 : vector<16x1xf32>
    %24 = arith.subf %22, %23 : vector<16x1xf32>
    %25 = vector.broadcast %17 : vector<16x1xf32> to vector<16x128xf32>
    %26 = arith.subf %13, %25 : vector<16x128xf32>
    %cst_15 = arith.constant 9.99999974E-6 : f32
    %27 = vector.broadcast %cst_15 : f32 to vector<16x1xf32>
    %28 = arith.addf %24, %27 : vector<16x1xf32>
    %29 = math.rsqrt %28 : vector<16x1xf32>
    %30 = vector.broadcast %29 : vector<16x1xf32> to vector<16x128xf32>
    %31 = arith.mulf %26, %30 : vector<16x128xf32>
    %c0_16 = arith.constant 0 : index
    %c0_17 = arith.constant 0 : index
    %32 = vector.load %arg6[%c0_16, %c0_17] : memref<1x128xf32, #tpu.memory_space<vmem>>, vector<1x128xf32>
    %33 = vector.broadcast %32 : vector<1x128xf32> to vector<16x128xf32>
    %34 = arith.mulf %31, %33 : vector<16x128xf32>
    %c0_18 = arith.constant 0 : index
    %c0_19 = arith.constant 0 : index
    %35 = vector.load %arg7[%c0_18, %c0_19] : memref<1x128xf32, #tpu.memory_space<vmem>>, vector<1x128xf32>
    %36 = vector.broadcast %35 : vector<1x128xf32> to vector<16x128xf32>
    %37 = arith.addf %34, %36 : vector<16x128xf32>
    %c0_20 = arith.constant 0 : index
    %c0_21 = arith.constant 0 : index
    %38 = vector.load %arg8[%c0_20, %c0_21] : memref<16x128xf32, #tpu.memory_space<vmem>>, vector<16x128xf32>
    tpu.vector_store %arg8[%c0_20, %c0_21], %37 {strides = array<i32>} : memref<16x128xf32, #tpu.memory_space<vmem>>, vector<16x128xf32>,
    return
  }
  func.func @transform_0(%arg0: i32) -> (i32, i32) {
    %c0_i32 = arith.constant 0 : i32
    %c0_i32_0 = arith.constant 0 : i32
    return %arg0, %c0_i32 : i32, i32
  }
  func.func @transform_1(%arg0: i32) -> (i32, i32) {
    %c0_i32 = arith.constant 0 : i32
    %c0_i32_0 = arith.constant 0 : i32
    %c0_i32_1 = arith.constant 0 : i32
    return %c0_i32, %c0_i32_0 : i32, i32
  }
  func.func @transform_2(%arg0: i32) -> (i32, i32) {
    %c0_i32 = arith.constant 0 : i32
    %c0_i32_0 = arith.constant 0 : i32
    %c0_i32_1 = arith.constant 0 : i32
    return %c0_i32, %c0_i32_0 : i32, i32
  }
  func.func @transform_3(%arg0: i32) -> (i32, i32) {
    %c0_i32 = arith.constant 0 : i32
    %c0_i32_0 = arith.constant 0 : i32
    %c0_i32_1 = arith.constant 0 : i32
    return %c0_i32, %c0_i32_0 : i32, i32
  }
  func.func @transform_4(%arg0: i32) -> (i32, i32) {
    %c0_i32 = arith.constant 0 : i32
    %c0_i32_0 = arith.constant 0 : i32
    %c0_i32_1 = arith.constant 0 : i32
    return %c0_i32, %c0_i32_0 : i32, i32
  }
  func.func @transform_5(%arg0: i32) -> (i32, i32) {
    %c0_i32 = arith.constant 0 : i32
    %c0_i32_0 = arith.constant 0 : i32
    %c0_i32_1 = arith.constant 0 : i32
    return %c0_i32, %c0_i32_0 : i32, i32
  }
  func.func @transform_6(%arg0: i32) -> (i32, i32) {
    %c0_i32 = arith.constant 0 : i32
    %c0_i32_0 = arith.constant 0 : i32
    %c0_i32_1 = arith.constant 0 : i32
    return %c0_i32, %c0_i32_0 : i32, i32
  }
  func.func @transform_7(%arg0: i32) -> (i32, i32) {
    %c0_i32 = arith.constant 0 : i32
    %c0_i32_0 = arith.constant 0 : i32
    return %arg0, %c0_i32 : i32, i32
  }
}

</mosaic_0001>

<bundles_post_ra>
// kernel: tpu_custom_call.1
= control target key start
LH: loop header
LB: loop body
LE: loop exit
PB: predicated region body
PF: predicated region fallthrough
CT: control target
= control target key end

     0   :  { %12 = vsyncpa [#allocation3], 0  ;;  %s932_s0 = inlined_call_operand.hbm [shape: f32[16,128], index: 0, kind: input, shape index: {}]   ;;  %s933_s1 = inlined_call_operand.hbm [shape: f32[128,128], index: 1, kind: input, shape index: {}]   ;;  %s934_s2 = inlined_call_operand.hbm [shape: f32[1,128], index: 2, kind: input, shape index: {}]   ;;  %s935_s3 = inlined_call_operand.hbm [shape: f32[128,128], index: 3, kind: input, shape index: {}]   ;;  %s936_s4 = inlined_call_operand.hbm [shape: f32[1,128], index: 4, kind: input, shape index: {}]   ;;  %s937_s5 = inlined_call_operand.hbm [shape: f32[1,128], index: 5, kind: input, shape index: {}]   ;;  %s938_s6 = inlined_call_operand.hbm [shape: f32[1,128], index: 6, kind: input, shape index: {}]   ;;  %s939_s7 = inlined_call_operand.hbm [shape: f32[16,128], index: 7, kind: output, shape index: {}]  }
   0x1   :  { %13 = vsyncpa [#allocation6], 0 }
   0x2   :  { %14 = vsyncpa [#allocation9], 0 }
   0x3   :  { %15 = vsyncpa [#allocation12], 0 }
   0x4   :  { %16 = vsyncpa [#allocation4], 0  ;;  %s756_s24 = smov [#allocation5]   ;;  %s757_s26 = smov [#allocation8]  }
   0x5   :  { %s34_s25 = sshll.u32 %s756_s24, 4  ;;  %s56_s27 = sshll.u32 %s757_s26, 4  ;;  %s35_s25 = int_to_ptr.vmem [resolvable:$true] %s34_s25  ;;  %s806_s27 = int_to_ptr.vmem [resolvable:$true] %s56_s27 }
   0x6   :  { %s570_s30 = scalar_lea.hbm %s933_s1, 2048 }
   0x7   :  { %p571_p0 = scmp.ne.s32.totalorder %s933_s1, %s570_s30  ;;  %p574_p1 = scmp.lt.u32.totalorder %s570_s30, %s933_s1 }
   0x9   :  { %p576_p2 = pnand %p574_p1, %p571_p0 }
   0xb   :  { %579 = shalt.err (!%p576_p2)
}
   0xc   :  { %s580_s12 = scalar_lea.vmem %s35_s25, 2048  ;;  %p585_p4 = scmp.lt.s32.totalorder %s35_s25, %s35_s25 }
   0xd   :  { %p581_p3 = scmp.ne.s32.totalorder %s35_s25, %s580_s12  ;;  %p586_p5 = scmp.lt.s32.totalorder %s580_s12, %s580_s12 }
   0xf   :  { %p587_p6 = por %p586_p5, %p585_p4 }
  0x11   :  { %p588_p7 = pnand %p587_p6, %p581_p3 }
  0x13   :  { %591 = shalt.err (!%p588_p7)
}
  0x14   :  { %s758_s13 = smov 128   ;;  %s759_s14 = smov 8  }
  0x15   :  { %40 = dma.hbm_to_vmem [thread:$0]  %s933_s1, 2048, %s35_s25, [#allocation6], %s758_s13, %s758_s13, %s759_s14  }
  0x16   :  { %s592_s19 = scalar_lea.hbm %s935_s3, 2048 }
  0x17   :  { %p593_p8 = scmp.ne.s32.totalorder %s935_s3, %s592_s19  ;;  %p596_p9 = scmp.lt.u32.totalorder %s592_s19, %s935_s3 }
  0x19   :  { %p598_p10 = pnand %p596_p9, %p593_p8 }
  0x1b   :  { %601 = shalt.err (!%p598_p10)
}
  0x1c   :  { %s602_s24 = scalar_lea.vmem %s806_s27, 2048  ;;  %p607_p12 = scmp.lt.s32.totalorder %s806_s27, %s806_s27 }
  0x1d   :  { %p603_p11 = scmp.ne.s32.totalorder %s806_s27, %s602_s24  ;;  %p608_p13 = scmp.lt.s32.totalorder %s602_s24, %s602_s24 }
  0x1f   :  { %p609_p0 = por %p608_p13, %p607_p12 }
  0x21   :  { %p610_p1 = pnand %p609_p0, %p603_p11 }
  0x23   :  { %613 = shalt.err (!%p610_p1)
}
  0x24   :  { %62 = dma.hbm_to_vmem [thread:$0]  %s935_s3, 2048, %s806_s27, [#allocation9], %s758_s13, %s758_s13, %s759_s14  }
  0x25   :  { %s760_s26 = smov [#allocation11]   ;;  %s761_s29 = smov [#allocation2]  }
  0x26   :  { %s79_s28 = sshll.u32 %s760_s26, 4  ;;  %s22_s30 = sshll.u32 %s761_s29, 4  ;;  %s80_s28 = int_to_ptr.vmem [resolvable:$true] %s79_s28  ;;  %s843_s30 = int_to_ptr.vmem [resolvable:$true] %s22_s30 }
  0x27   :  { %s614_s10 = scalar_lea.hbm %s937_s5, 16 }
  0x28   :  { %p615_p2 = scmp.ne.s32.totalorder %s937_s5, %s614_s10  ;;  %p618_p3 = scmp.lt.u32.totalorder %s614_s10, %s937_s5 }
  0x2a   :  { %p620_p4 = pnand %p618_p3, %p615_p2 }
  0x2c   :  { %623 = shalt.err (!%p620_p4)
}
  0x2d   :  { %s624_s3 = scalar_lea.vmem %s80_s28, 16  ;;  %s628_s27 = scalar_lea.vmem %s80_s28, 32 }
  0x2e   :  { %p625_p5 = scmp.ne.s32.totalorder %s80_s28, %s624_s3  ;;  %p629_p6 = scmp.lt.s32.totalorder %s80_s28, %s80_s28 }
  0x2f   :  { %p630_p7 = scmp.lt.s32.totalorder %s628_s27, %s624_s3 }
  0x31   :  { %p631_p8 = por %p630_p7, %p629_p6 }
  0x33   :  { %p632_p9 = pnand %p631_p8, %p625_p5 }
  0x35   :  { %635 = shalt.err (!%p632_p9)
}
  0x36   :  { %82 = dma.hbm_to_vmem [thread:$0]  %s937_s5, 16, %s80_s28, [#allocation12]  }
  0x37   :  { %s636_s21 = scalar_lea.hbm %s932_s0, 256 }
  0x38   :  { %p637_p10 = scmp.ne.s32.totalorder %s932_s0, %s636_s21  ;;  %p640_p11 = scmp.lt.u32.totalorder %s636_s21, %s932_s0 }
  0x3a   :  { %p642_p12 = pnand %p640_p11, %p637_p10 }
  0x3c   :  { %645 = shalt.err (!%p642_p12)
}
  0x3d   :  { %s646_s25 = scalar_lea.vmem %s843_s30, 256  ;;  %p651_p0 = scmp.lt.s32.totalorder %s843_s30, %s843_s30 }
  0x3e   :  { %p647_p13 = scmp.ne.s32.totalorder %s843_s30, %s646_s25  ;;  %p652_p1 = scmp.lt.s32.totalorder %s646_s25, %s646_s25 }
  0x40   :  { %p653_p2 = por %p652_p1, %p651_p0 }
  0x42   :  { %p654_p3 = pnand %p653_p2, %p647_p13 }
  0x44   :  { %657 = shalt.err (!%p654_p3)
}
  0x45   :  { %28 = dma.hbm_to_vmem [thread:$0]  %s932_s0, 256, %s843_s30, [#allocation3], %s758_s13, %s758_s13, %s759_s14  }
  0x46   :  { %s762_s28 = smov [#allocation7]   ;;  %s763_s8 = smov [#allocation10]  }
  0x47   :  { %s47_s29 = sshll.u32 %s762_s28, 4  ;;  %s69_s9 = sshll.u32 %s763_s8, 4  ;;  %s48_s29 = int_to_ptr.vmem [resolvable:$true] %s47_s29  ;;  %s70_s9 = int_to_ptr.vmem [resolvable:$true] %s69_s9 }
  0x48   :  { %s658_s12 = scalar_lea.hbm %s934_s2, 16 }
  0x49   :  { %p659_p4 = scmp.ne.s32.totalorder %s934_s2, %s658_s12  ;;  %p662_p5 = scmp.lt.u32.totalorder %s658_s12, %s934_s2 }
  0x4b   :  { %p664_p6 = pnand %p662_p5, %p659_p4 }
  0x4d   :  { %667 = shalt.err (!%p664_p6)
}
  0x4e   :  { %s668_s0 = scalar_lea.vmem %s48_s29, 16  ;;  %s672_s30 = scalar_lea.vmem %s48_s29, 32 }
  0x4f   :  { %p669_p7 = scmp.ne.s32.totalorder %s48_s29, %s668_s0  ;;  %p673_p8 = scmp.lt.s32.totalorder %s48_s29, %s48_s29 }
  0x50   :  { %p674_p9 = scmp.lt.s32.totalorder %s672_s30, %s668_s0 }
  0x52   :  { %p675_p10 = por %p674_p9, %p673_p8 }
  0x54   :  { %p676_p11 = pnand %p675_p10, %p669_p7 }
  0x56   :  { %679 = shalt.err (!%p676_p11)
}
  0x57   :  { %50 = dma.hbm_to_vmem [thread:$0]  %s934_s2, 16, %s48_s29, [#allocation6]  }
  0x58   :  { %s680_s21 = scalar_lea.hbm %s936_s4, 16 }
  0x59   :  { %p681_p12 = scmp.ne.s32.totalorder %s936_s4, %s680_s21  ;;  %p684_p13 = scmp.lt.u32.totalorder %s680_s21, %s936_s4 }
  0x5b   :  { %p686_p0 = pnand %p684_p13, %p681_p12 }
  0x5d   :  { %689 = shalt.err (!%p686_p0)
}
  0x5e   :  { %s690_s25 = scalar_lea.vmem %s70_s9, 16  ;;  %s694_s5 = scalar_lea.vmem %s70_s9, 32 }
  0x5f   :  { %p691_p1 = scmp.ne.s32.totalorder %s70_s9, %s690_s25  ;;  %p695_p2 = scmp.lt.s32.totalorder %s70_s9, %s70_s9 }
  0x60   :  { %p696_p3 = scmp.lt.s32.totalorder %s694_s5, %s690_s25 }
  0x62   :  { %p697_p4 = por %p696_p3, %p695_p2 }
  0x64   :  { %p698_p5 = pnand %p697_p4, %p691_p1 }
  0x66   :  { %701 = shalt.err (!%p698_p5)
}
  0x67   :  { %72 = dma.hbm_to_vmem [thread:$0]  %s936_s4, 16, %s70_s9, [#allocation9]  }
  0x68   :  { %s764_s28 = smov [#allocation13]   ;;  %s702_s11 = scalar_lea.hbm %s938_s6, 16 }
  0x69   :  { %s89_s29 = sshll.u32 %s764_s28, 4  ;;  %p703_p6 = scmp.ne.s32.totalorder %s938_s6, %s702_s11  ;;  %s90_s29 = int_to_ptr.vmem [resolvable:$true] %s89_s29 }
  0x6a   :  { %p706_p7 = scmp.lt.u32.totalorder %s702_s11, %s938_s6 }
  0x6c   :  { %p708_p8 = pnand %p706_p7, %p703_p6 }
  0x6e   :  { %711 = shalt.err (!%p708_p8)
}
  0x6f   :  { %s712_s27 = scalar_lea.vmem %s90_s29, 16  ;;  %s716_s4 = scalar_lea.vmem %s90_s29, 32 }
  0x70   :  { %p713_p9 = scmp.ne.s32.totalorder %s90_s29, %s712_s27  ;;  %p717_p10 = scmp.lt.s32.totalorder %s90_s29, %s90_s29 }
  0x71   :  { %p718_p11 = scmp.lt.s32.totalorder %s716_s4, %s712_s27 }
  0x73   :  { %p719_p12 = por %p718_p11, %p717_p10 }
  0x75   :  { %p720_p13 = pnand %p719_p12, %p713_p9 }
  0x77   :  { %723 = shalt.err (!%p720_p13)
}
  0x78   :  { %92 = dma.hbm_to_vmem [thread:$0]  %s938_s6, 16, %s90_s29, [#allocation12]  }
  0x79   :  { %746 = dma.done.wait [#allocation3], 256  }
  0x7a   :  { %747 = vsyncadd [#allocation3], 4294967040 }
  0x7b   :  { %748 = dma.done.wait [#allocation6], 2064  }
  0x7c   :  { %749 = vsyncadd [#allocation6], 4294965232 }
  0x7d   :  { %750 = dma.done.wait [#allocation9], 2064  }
  0x7e   :  { %751 = vsyncadd [#allocation9], 4294965232 }
  0x7f   :  { %752 = dma.done.wait [#allocation12], 32  }
  0x80   :  { %753 = vsyncadd [#allocation12], 4294967264  ;;  %v116_v0 = vld [vmem:[#allocation5] sm:$0xff]  ;;  %v117_v1 = vld [vmem:[#allocation5 + $0x8] sm:$0xff]  ;;  %s765_s6 = smov [#allocation14]  }
  0x81   :  { %v118_v2 = vld [vmem:[#allocation5 + $0x10] sm:$0xff]  ;;  %v492_v3 = vpack.c.bf16 %v117_v1, %v116_v0  ;;  %v119_v4 = vld [vmem:[#allocation5 + $0x18] sm:$0xff]  ;;  %v120_v6 = vld [vmem:[#allocation5 + $0x20] sm:$0xff]  ;;  %s367_s30 = sshll.u32 %s765_s6, 4  ;;  %s368_s30 = int_to_ptr.vmem [resolvable:$true] %s367_s30 }
  0x82   :  { %v496_v5 = vpack.c.bf16 %v119_v4, %v118_v2  ;;  %v121_v7 = vld [vmem:[#allocation5 + $0x28] sm:$0xff]  ;;  %v122_v9 = vld [vmem:[#allocation5 + $0x30] sm:$0xff]  ;;  %v123_v10 = vld [vmem:[#allocation5 + $0x38] sm:$0xff]  ;;  %s724_s17 = scalar_lea.vmem %s368_s30, 256  ;;  %p729_p1 = scmp.lt.s32.totalorder %s368_s30, %s368_s30 }
  0x83   :  { %493 = vmatprep.subr.bf16.mxu0 %v492_v3  ;;  %v500_v8 = vpack.c.bf16 %v121_v7, %v120_v6  ;;  %v913_v11 = vld [vmem:[#allocation2] sm:$0xff]  ;;  %v216_v12 = vld [vmem:[#allocation8] sm:$0xff]  ;;  %v219_v16 = vld [vmem:[#allocation8 + $0x18] sm:$0xff]  ;;  %v504_v20 = vpack.c.bf16 %v123_v10, %v122_v9  ;;  %p725_p0 = scmp.ne.s32.totalorder %s368_s30, %s724_s17  ;;  %p730_p2 = scmp.lt.s32.totalorder %s724_s17, %s724_s17 }
  0x84   :  { %495 = vmatpush3.bf16.msra.mxu0 %v492_v3  ;;  %454 = vmatprep.mubr.f32.mxu0 %v913_v11  ;;  %v217_v13 = vld [vmem:[#allocation8 + $0x8] sm:$0xff]  ;;  %v218_v14 = vld [vmem:[#allocation8 + $0x10] sm:$0xff]  ;;  %v220_v18 = vld [vmem:[#allocation8 + $0x20] sm:$0xff] }
  0x85   :  { %497 = vmatprep.subr.bf16.mxu0 %v496_v5  ;;  %v524_v15 = vpack.c.bf16 %v217_v13, %v216_v12  ;;  %v528_v17 = vpack.c.bf16 %v219_v16, %v218_v14  ;;  %v221_v19 = vld [vmem:[#allocation8 + $0x28] sm:$0xff]  ;;  %v124_v21 = vld [vmem:[#allocation5 + $0x40] sm:$0xff]  ;;  %v222_v24 = vld [vmem:[#allocation8 + $0x30] sm:$0xff]  ;;  %p731_p3 = por %p730_p2, %p729_p1 }
  0x86   :  { %v125_v22 = vld [vmem:[#allocation5 + $0x48] sm:$0xff]  ;;  %v532_v23 = vpack.c.bf16 %v221_v19, %v220_v18  ;;  %v223_v25 = vld [vmem:[#allocation8 + $0x38] sm:$0xff]  ;;  %v126_v27 = vld [vmem:[#allocation5 + $0x50] sm:$0xff] }
  0x87   :  { %525 = vmatprep.subr.bf16.mxu1 %v524_v15  ;;  %v508_v26 = vpack.c.bf16 %v125_v22, %v124_v21  ;;  %v127_v28 = vld [vmem:[#allocation5 + $0x58] sm:$0xff]  ;;  %v536_v29 = vpack.c.bf16 %v223_v25, %v222_v24  ;;  %v224_v30 = vld [vmem:[#allocation8 + $0x40] sm:$0xff]  ;;  %v225_v31 = vld [vmem:[#allocation8 + $0x48] sm:$0xff]  ;;  %p732_p4 = pnand %p731_p3, %p725_p0 }
  0x88   :  { %499 = vmatpush3.bf16.msra.mxu0 %v496_v5  ;;  %527 = vmatpush3.bf16.msra.mxu1 %v524_v15  ;;  %v512_v32 = vpack.c.bf16 %v127_v28, %v126_v27  ;;  %v128_v33 = vld [vmem:[#allocation5 + $0x60] sm:$0xff]  ;;  %v129_v34 = vld [vmem:[#allocation5 + $0x68] sm:$0xff]  ;;  %v540_v35 = vpack.c.bf16 %v225_v31, %v224_v30  ;;  %v226_v36 = vld [vmem:[#allocation8 + $0x50] sm:$0xff] }
  0x89   :  { %501 = vmatprep.subr.bf16.mxu0 %v500_v8  ;;  %529 = vmatprep.subr.bf16.mxu1 %v528_v17  ;;  %v227_v37 = vld [vmem:[#allocation8 + $0x58] sm:$0xff]  ;;  %v516_v38 = vpack.c.bf16 %v129_v34, %v128_v33  ;;  %v130_v39 = vld [vmem:[#allocation5 + $0x70] sm:$0xff]  ;;  %v228_v42 = vld [vmem:[#allocation8 + $0x60] sm:$0xff] }
  0x8a   :  { %v131_v40 = vld [vmem:[#allocation5 + $0x78] sm:$0xff]  ;;  %v544_v41 = vpack.c.bf16 %v227_v37, %v226_v36  ;;  %v229_v43 = vld [vmem:[#allocation8 + $0x68] sm:$0xff]  ;;  %v382_v50 = vld [vmem:[#allocation7] ss:$0 sm:$0xff] }
  0x8b   :  { %v520_v44 = vpack.c.bf16 %v131_v40, %v130_v39  ;;  %v548_v45 = vpack.c.bf16 %v229_v43, %v228_v42  ;;  %v115_v46 = vld [vmem:[#allocation2 + $0x8] sm:$0xff]  ;;  %v383_v57 = vld [vmem:[#allocation10] ss:$0 sm:$0xff]  ;;  %v384_v18 = vld [vmem:[#allocation11] ss:$0 sm:$0xff] }
  0x8c   :  { %503 = vmatpush3.bf16.msra.mxu0 %v500_v8  ;;  %531 = vmatpush3.bf16.msra.mxu1 %v528_v17  ;;  %v230_v47 = vld [vmem:[#allocation8 + $0x70] sm:$0xff]  ;;  %v231_v48 = vld [vmem:[#allocation8 + $0x78] sm:$0xff] }
  0x8d   :  { %505 = vmatprep.subr.bf16.mxu0 %v504_v20  ;;  %533 = vmatprep.subr.bf16.mxu1 %v532_v23  ;;  %v552_v49 = vpack.c.bf16 %v231_v48, %v230_v47 }
  0x90   :  { %507 = vmatpush3.bf16.msra.mxu0 %v504_v20  ;;  %535 = vmatpush3.bf16.msra.mxu1 %v532_v23  ;;  %v385_v20 = vld [vmem:[#allocation13] ss:$0 sm:$0xff] }
  0x91   :  { %509 = vmatprep.subr.bf16.mxu0 %v508_v26  ;;  %537 = vmatprep.subr.bf16.mxu1 %v536_v29 }
  0x94   :  { %511 = vmatpush3.bf16.msra.mxu0 %v508_v26  ;;  %539 = vmatpush3.bf16.msra.mxu1 %v536_v29 }
  0x95   :  { %513 = vmatprep.subr.bf16.mxu0 %v512_v32  ;;  %541 = vmatprep.subr.bf16.mxu1 %v540_v35 }
  0x98   :  { %515 = vmatpush3.bf16.msra.mxu0 %v512_v32  ;;  %543 = vmatpush3.bf16.msra.mxu1 %v540_v35 }
  0x99   :  { %517 = vmatprep.subr.bf16.mxu0 %v516_v38  ;;  %545 = vmatprep.subr.bf16.mxu1 %v544_v41 }
  0x9c   :  { %519 = vmatpush3.bf16.msra.mxu0 %v516_v38  ;;  %547 = vmatpush3.bf16.msra.mxu1 %v544_v41 }
  0x9d   :  { %521 = vmatprep.subr.bf16.mxu0 %v520_v44  ;;  %549 = vmatprep.subr.bf16.mxu1 %v548_v45 }
  0xa0   :  { %523 = vmatpush3.bf16.msra.mxu0 %v520_v44  ;;  %551 = vmatpush3.bf16.msra.mxu1 %v548_v45 }
  0xa1   :  { %553 = vmatprep.subr.bf16.mxu1 %v552_v49 }
  0xa3   :  { %455 = vmatmul.mubr.f32.vlgmr.msra.gmra.mrb[0].mxu0 %v115_v46 }
  0xa4   :  { %555 = vmatpush3.bf16.msra.mxu1 %v552_v49 }
 0x176   :  { %v456_v51 = vpop.f32.mrb[0].mxu0 }
 0x177   :  { %v211_v52 = vadd.f32 %v456_v51, %v382_v50  ;;  %v205_v53 = vpop.f32.mrb[1].mxu0 }
 0x178   :  { %v206_v54 = vadd.f32 %v382_v50, %v205_v53 }
 0x179   :  { %v215_v56 = vmax.f32 %v211_v52, 0.0 }
 0x17a   :  { %v214_v55 = vmax.f32 %v206_v54, 0.0 }
 0x17c   :  { %489 = vmatprep.mubr.f32.mxu1 %v214_v55 }
 0x17d   :  { %490 = vmatmul.mubr.f32.vlgmr.msra.gmra.mrb[0].mxu1 %v215_v56 }
 0x250   :  { %v491_v58 = vpop.f32.mrb[0].mxu1 }
 0x251   :  { %v305_v59 = vpop.f32.mrb[1].mxu1  ;;  %v311_v60 = vadd.f32 %v491_v58, %v383_v57 }
 0x252   :  { %v306_v61 = vadd.f32 %v383_v57, %v305_v59 }
 0x253   :  { %v315_v63 = vadd.f32 %v311_v60, %v115_v46 }
 0x254   :  { %v314_v62 = vadd.f32 %v306_v61, %v913_v11 }
 0x255   :  { %v323_v1 = vmul.f32 %v315_v63, %v315_v63 }
 0x256   :  { %316 = vadd.xlane.f32.xlu0 %v314_v62  ;;  %v322_v0 = vmul.f32 %v314_v62, %v314_v62 }
 0x258   :  { %324 = vadd.xlane.f32.xlu1 %v322_v0 }
 0x25a   :  { %318 = vadd.xlane.f32.xlu0 %v315_v63 }
 0x25c   :  { %326 = vadd.xlane.f32.xlu1 %v323_v1 }
 0x2e3   :  { %v317_v2 = vpop.xlane.xlu0 %316 }
 0x2e4   :  { %v320_v3 = vmul.f32 0.03125, %v317_v2 }
 0x2e5   :  { %v325_v4 = vpop.xlane.xlu1 %324 }
 0x2e6   :  { %v330_v5 = vmul.f32 %v320_v3, %v320_v3  ;;  %v328_v6 = vmul.f32 0.03125, %v325_v4  ;;  %v334_v16 = vsub.f32 %v314_v62, %v320_v3 }
 0x2e7   :  { %v319_v7 = vpop.xlane.xlu0 %318 }
 0x2e8   :  { %v332_v8 = vsub.f32 %v328_v6, %v330_v5  ;;  %v321_v9 = vmul.f32 0.03125, %v319_v7 }
 0x2e9   :  { %v327_v10 = vpop.xlane.xlu1 %326 }
 0x2ea   :  { %v336_v12 = vadd.f32 1e-05, %v332_v8  ;;  %v331_v13 = vmul.f32 %v321_v9, %v321_v9  ;;  %v329_v14 = vmul.f32 0.03125, %v327_v10  ;;  %v335_v21 = vsub.f32 %v315_v63, %v321_v9 }
 0x2ec   :  { %566 = vrsqrt.f32 %v336_v12  ;;  %v333_v11 = vsub.f32 %v329_v14, %v331_v13 }
 0x2ee   :  { %v337_v15 = vadd.f32 1e-05, %v333_v11 }
 0x2f0   :  { %568 = vrsqrt.f32 %v337_v15 }
 0x2f6   :  { %v567_v17 = vpop.eup %566 }
 0x2f7   :  { %v340_v19 = vmul.f32 %v567_v17, %v334_v16 }
 0x2f9   :  { %v349_v22 = vmul.f32 %v384_v18, %v340_v19 }
 0x2fa   :  { %v569_v23 = vpop.eup %568 }
 0x2fb   :  { %v341_v24 = vmul.f32 %v569_v23, %v335_v21  ;;  %v358_v25 = vadd.f32 %v385_v20, %v349_v22 }
 0x2fd   :  { %v350_v26 = vmul.f32 %v384_v18, %v341_v24  ;;  %360 = vst [vmem:[#allocation14] sm:$0xff] %v358_v25 }
 0x2ff   :  { %v359_v27 = vadd.f32 %v385_v20, %v350_v26 }
 0x301   :  { %361 = vst [vmem:[#allocation14 + $0x8] sm:$0xff] %v359_v27 }
 0x302   :  { %735 = shalt.err (!%p732_p4)
}
 0x303   :  { %s736_s20 = scalar_lea.hbm %s939_s7, 256 }
 0x304   :  { %p737_p5 = scmp.ne.s32.totalorder %s939_s7, %s736_s20  ;;  %p740_p6 = scmp.lt.u32.totalorder %s736_s20, %s939_s7 }
 0x306   :  { %p742_p7 = pnand %p740_p6, %p737_p5 }
 0x308   :  { %745 = shalt.err (!%p742_p7)
}
 0x309   :  { %373 = dma.vmem_to_hbm [thread:$0]  %s368_s30, 256, %s939_s7, [#allocation4], %s758_s13, %s758_s13, %s759_s14  }
 0x30a   :  { %754 = dma.done.wait [#allocation4], 256  }
 0x30b   :  { %755 = vsyncadd [#allocation4], 4294967040 }
 0x30c   :  { %377 = vsyncpa [#allocation3], 1 }
 0x30d   :  { %378 = vsyncpa [#allocation6], 1 }
 0x30e   :  { %379 = vsyncpa [#allocation9], 1 }
 0x30f   :  { %380 = vsyncpa [#allocation12], 1 }
 0x310   :  { %381 = vsyncpa [#allocation4], 1 }

</bundles_post_ra>
